<compile_context>
chip_gen: v6e
topology: v6e:2x2x1
jax: 0.10.0
libtpu: 0.0.40
codegen_flags: <defaults>
</compile_context>

<pallas_src>
import functools

import jax
import jax.numpy as jnp
from jax.experimental import pallas as pl
from jax.experimental.pallas import tpu as pltpu


def lstm_model_kernel(x_ref, wih_ref, whh_ref, b_ref,
                      w1_ref, b1_ref, w2_ref, b2_ref,
                      out_ref, *, hidden_size, num_chains):
    T, TB, _ = x_ref.shape
    H = hidden_size
    rows = TB // num_chains

    # ---- hoisted gate-lane constants --------------------------------------
    # PyTorch gate order along 4H is [i, f, g, o]: sigmoid for i/f/o, tanh for g.
    # sigmoid(x) = 0.5*tanh(x/2) + 0.5, so with the pre-activation pre-scaled by
    # 0.5 on the i/f/o lanes a single tanh pass + per-lane FMA yields all gates.
    lane = jax.lax.broadcasted_iota(jnp.int32, (1, 4 * H), 1)
    is_g = jnp.logical_and(lane >= 2 * H, lane < 3 * H)
    scale = jnp.where(is_g, 1.0, 0.5).astype(jnp.float32)     # (1, 4H)
    shift = jnp.where(is_g, 0.0, 0.5).astype(jnp.float32)     # (1, 4H)

    # Fold the 0.5 pre-scale into the (tiny) weights once per grid step so the
    # multiply is off the per-step serial chain.  *0.5 is exact in bf16.
    wih_s = wih_ref[...] * scale                               # (1, 4H) f32
    b_s = b_ref[...] * scale                                   # (1, 4H) f32
    whh_s_bf = (whh_ref[...] * scale).astype(jnp.bfloat16)     # (H, 4H) bf16

    def step(h, c, xt):
        # xt: (rows, 1).  input_size == 1  =>  x_t @ W_ih^T is a broadcast
        # multiply, recomputed per step (no materialized xproj temp).
        pre = xt * wih_s + b_s + jnp.dot(
            h.astype(jnp.bfloat16), whh_s_bf,
            preferred_element_type=jnp.float32)                # (rows, 4H)
        act = jnp.tanh(pre) * scale + shift   # sigmoid on i/f/o lanes, tanh on g
        i_g = act[:, 0:H]
        f_g = act[:, H:2 * H]
        g_g = act[:, 2 * H:3 * H]
        o_g = act[:, 3 * H:4 * H]
        c = f_g * c + i_g * g_g
        h = o_g * jnp.tanh(c)
        return h, c

    hs = [jnp.zeros((rows, H), jnp.float32) for _ in range(num_chains)]
    cs = [jnp.zeros((rows, H), jnp.float32) for _ in range(num_chains)]

    # Fully unrolled recurrence (T static, small).  The sub-chains are data
    # independent, so the scheduler can overlap one chain's MXU push with the
    # other chain's EUP/VPU work inside each unrolled step.
    for t in range(T):
        xt = x_ref[t]                                          # (TB, 1)
        for n in range(num_chains):
            hs[n], cs[n] = step(hs[n], cs[n], xt[n * rows:(n + 1) * rows, :])

    h = hs[0] if num_chains == 1 else jnp.concatenate(hs, axis=0)   # (TB, H)

    # Dropout(0.5) is identity at inference.
    w1_bf = w1_ref[...].astype(jnp.bfloat16)                   # (H, 10)
    w2_bf = w2_ref[...].astype(jnp.bfloat16)                   # (10, C)
    z1 = jnp.dot(h.astype(jnp.bfloat16), w1_bf,
                 preferred_element_type=jnp.float32) + b1_ref[...]
    z1 = jnp.maximum(z1, 0.0)                                  # ReLU
    logits = jnp.dot(z1.astype(jnp.bfloat16), w2_bf,
                     preferred_element_type=jnp.float32) + b2_ref[...]

    # Softmax over dim=1 (classes); exact normalization (runs once per tile).
    m = jnp.max(logits, axis=1, keepdims=True)
    e = jnp.exp(logits - m)
    out_ref[...] = e / jnp.sum(e, axis=1, keepdims=True)


def _pick_block_b(B):
    """Batch-tile heuristic: big tiles (fill the MXU M dim, amortize per-step
    overhead) but >= 2 grid steps whenever possible (v7x has two TensorCores),
    with bounded zero-padding waste."""
    if B <= 8:
        return B
    for tb in (512, 256, 128, 64, 32, 16, 8):
        padded = -(-B // tb) * tb
        if padded // tb >= 2 and padded - B <= max(B // 4, 7):
            return tb
    return 8


def lstm_model_forward(x, params, *, block_b=None):
    """x: (B, T, 1) float32 -> (B, num_classes) float32 softmax probabilities."""
    B, T, in_sz = x.shape
    assert in_sz == 1
    x = x.astype(jnp.float32)

    wih_t = params["w_ih"].T                             # (1, 4H)
    whh_t = params["w_hh"].T                             # (H, 4H)
    b_all = (params["b_ih"] + params["b_hh"])[None, :]   # (1, 4H)
    w1_t = params["w_fc1"].T                             # (H, 10)
    b1 = params["b_fc1"][None, :]                        # (1, 10)
    w2_t = params["w_fc2"].T                             # (10, C)
    b2 = params["b_fc2"][None, :]                        # (1, C)

    H = whh_t.shape[0]
    C = w2_t.shape[1]

    if block_b is None:
        block_b = _pick_block_b(B)

    # Zero-pad batch to a multiple of the tile (sliced off at the end).
    Bp = -(-B // block_b) * block_b

    # Time-major layout (T, B, 1): per-step access is a static leading index,
    # batch sits on the sublane axis.  Pure layout plumbing in the wrapper.
    x_tb = jnp.transpose(x, (1, 0, 2))                    # (T, B, 1)
    if Bp != B:
        x_tb = jnp.pad(x_tb, ((0, 0), (0, Bp - B), (0, 0)))

    # Two interleaved sub-chains when each half stays sublane-aligned.
    num_chains = 2 if (block_b >= 16 and block_b % 16 == 0) else 1

    grid = (Bp // block_b,)

    def const(shape):
        # Weights/biases: whole array resident across the batch grid.
        return pl.BlockSpec(shape, lambda i: (0,) * len(shape))

    kernel = functools.partial(lstm_model_kernel, hidden_size=H,
                               num_chains=num_chains)

    out = pl.pallas_call(
        kernel,
        out_shape=jax.ShapeDtypeStruct((Bp, C), jnp.float32),
        grid=grid,
        in_specs=[
            pl.BlockSpec((T, block_b, 1), lambda i: (0, i, 0)),   # x (time-major)
            const((1, 4 * H)),                                    # W_ih^T
            const((H, 4 * H)),                                    # W_hh^T
            const((1, 4 * H)),                                    # b_ih + b_hh
            const((H, 10)),                                       # W_fc1^T
            const((1, 10)),                                       # b_fc1
            const((10, C)),                                       # W_fc2^T
            const((1, C)),                                        # b_fc2
        ],
        out_specs=pl.BlockSpec((block_b, C), lambda i: (i, 0)),
        compiler_params=pltpu.CompilerParams(
            dimension_semantics=("parallel",)),
    )(x_tb, wih_t, whh_t, b_all, w1_t, b1, w2_t, b2)

    return out if Bp == B else out[:B]


def init_params(key, input_size=1, hidden_size=32, num_classes=18):
    """Deterministic synthetic params matching nn.LSTM / nn.Linear shapes."""
    ks = jax.random.split(key, 8)
    s_lstm = 1.0 / jnp.sqrt(hidden_size)
    s_fc1 = 1.0 / jnp.sqrt(hidden_size)
    s_fc2 = 1.0 / jnp.sqrt(10.0)
    u = lambda k, shape, s: jax.random.uniform(k, shape, jnp.float32, -s, s)
    return {
        "w_ih": u(ks[0], (4 * hidden_size, input_size), s_lstm),
        "w_hh": u(ks[1], (4 * hidden_size, hidden_size), s_lstm),
        "b_ih": u(ks[2], (4 * hidden_size,), s_lstm),
        "b_hh": u(ks[3], (4 * hidden_size,), s_lstm),
        "w_fc1": u(ks[4], (10, hidden_size), s_fc1),
        "b_fc1": u(ks[5], (10,), s_fc1),
        "w_fc2": u(ks[6], (num_classes, 10), s_fc2),
        "b_fc2": u(ks[7], (num_classes,), s_fc2),
    }


def reference_forward(x, params):
    """Pure-JAX f32 reference of the PyTorch forward (eval mode)."""
    B, T, _ = x.shape
    H = params["w_hh"].shape[1]
    wih, whh = params["w_ih"], params["w_hh"]
    b = params["b_ih"] + params["b_hh"]
    h = jnp.zeros((B, H), jnp.float32)
    c = jnp.zeros((B, H), jnp.float32)
    for t in range(T):
        gates = x[:, t, :] @ wih.T + h @ whh.T + b
        i = jax.nn.sigmoid(gates[:, :H])
        f = jax.nn.sigmoid(gates[:, H:2 * H])
        g = jnp.tanh(gates[:, 2 * H:3 * H])
        o = jax.nn.sigmoid(gates[:, 3 * H:])
        c = f * c + i * g
        h = o * jnp.tanh(c)
    z1 = jnp.maximum(h @ params["w_fc1"].T + params["b_fc1"], 0.0)
    logits = z1 @ params["w_fc2"].T + params["b_fc2"]
    return jax.nn.softmax(logits, axis=1)


if __name__ == "__main__":
    key = jax.random.PRNGKey(0)
    k_x, k_p = jax.random.split(key)

    IN, H, C = 1, 32, 18
    params = init_params(k_p, input_size=IN, hidden_size=H, num_classes=C)

    # Cases: small single-tile batch, multi-tile batch with 2 interleaved
    # chains (grid >= 2), and a batch that exercises the zero-padding path.
    for (B, T) in ((8, 8), (32, 8), (20, 6)):
        kx = jax.random.fold_in(k_x, B * 100 + T)
        x = jax.random.normal(kx, (B, T, IN), jnp.float32)

        out = jax.block_until_ready(lstm_model_forward(x, params))
        assert out.shape == (B, C)
        # Exact softmax divide => rows sum to 1 to f32 precision.
        assert jnp.allclose(jnp.sum(out, axis=1), 1.0, atol=1e-5)
        # Validate against f32 pure-JAX reference (bf16 MXU drift only).
        ref = reference_forward(x, params)
        err = float(jnp.max(jnp.abs(out - ref)))
        assert err < 2e-2, f"max abs err {err} too large for B={B}, T={T}"

    print("KERNEL_OK")
</pallas_src>

<mosaic_0001>
module attributes {stable_mosaic.version = 11 : i64} {
  func.func @lstm_model_kernel(%arg0: i32, %arg1: memref<8x8x1xf32, #tpu.memory_space<vmem>>, %arg2: memref<1x128xf32, #tpu.memory_space<vmem>>, %arg3: memref<32x128xf32, #tpu.memory_space<vmem>>, %arg4: memref<1x128xf32, #tpu.memory_space<vmem>>, %arg5: memref<32x10xf32, #tpu.memory_space<vmem>>, %arg6: memref<1x10xf32, #tpu.memory_space<vmem>>, %arg7: memref<10x18xf32, #tpu.memory_space<vmem>>, %arg8: memref<1x18xf32, #tpu.memory_space<vmem>>, %arg9: memref<8x18xf32, #tpu.memory_space<vmem>>) attributes {dimension_semantics = [#tpu.dimension_semantics<parallel>], iteration_bounds = array<i64: 1>, scalar_prefetch = 0 : i64, scratch_operands = 0 : i64, tpu.core_type = #tpu.core_type<tc>, window_params = [{transform_indices = @transform_0, window_bounds = array<i64: 8, 8, 1>}, {pipeline_mode = #tpu.pipeline_mode<synchronous>, transform_indices = @transform_1, window_bounds = array<i64: 1, 128>}, {pipeline_mode = #tpu.pipeline_mode<synchronous>, transform_indices = @transform_2, window_bounds = array<i64: 32, 128>}, {pipeline_mode = #tpu.pipeline_mode<synchronous>, transform_indices = @transform_3, window_bounds = array<i64: 1, 128>}, {pipeline_mode = #tpu.pipeline_mode<synchronous>, transform_indices = @transform_4, window_bounds = array<i64: 32, 10>}, {pipeline_mode = #tpu.pipeline_mode<synchronous>, transform_indices = @transform_5, window_bounds = array<i64: 1, 10>}, {pipeline_mode = #tpu.pipeline_mode<synchronous>, transform_indices = @transform_6, window_bounds = array<i64: 10, 18>}, {pipeline_mode = #tpu.pipeline_mode<synchronous>, transform_indices = @transform_7, window_bounds = array<i64: 1, 18>}, {transform_indices = @transform_8, window_bounds = array<i64: 8, 18>}]} {
    %0 = tpu.iota {dimensions = array<i32: 1>} : vector<1x128xi32>
    %c64_i32 = arith.constant 64 : i32
    %1 = vector.broadcast %c64_i32 : i32 to vector<1x128xi32>
    %2 = arith.cmpi sge, %0, %1 : vector<1x128xi32>
    %c96_i32 = arith.constant 96 : i32
    %3 = vector.broadcast %c96_i32 : i32 to vector<1x128xi32>
    %4 = arith.cmpi slt, %0, %3 : vector<1x128xi32>
    %5 = arith.andi %2, %4 : vector<1x128xi1>
    %cst = arith.constant 1.000000e+00 : f32
    %cst_0 = arith.constant 5.000000e-01 : f32
    %6 = vector.broadcast %cst : f32 to vector<1x128xf32>
    %7 = vector.broadcast %cst_0 : f32 to vector<1x128xf32>
    %8 = arith.select %5, %6, %7 : vector<1x128xi1>, vector<1x128xf32>
    %cst_1 = arith.constant 0.000000e+00 : f32
    %cst_2 = arith.constant 5.000000e-01 : f32
    %9 = vector.broadcast %cst_1 : f32 to vector<1x128xf32>
    %10 = vector.broadcast %cst_2 : f32 to vector<1x128xf32>
    %11 = arith.select %5, %9, %10 : vector<1x128xi1>, vector<1x128xf32>
    %c0 = arith.constant 0 : index
    %c0_3 = arith.constant 0 : index
    %12 = vector.load %arg2[%c0, %c0_3] : memref<1x128xf32, #tpu.memory_space<vmem>>, vector<1x128xf32>
    %13 = arith.mulf %12, %8 : vector<1x128xf32>
    %c0_4 = arith.constant 0 : index
    %c0_5 = arith.constant 0 : index
    %14 = vector.load %arg4[%c0_4, %c0_5] : memref<1x128xf32, #tpu.memory_space<vmem>>, vector<1x128xf32>
    %15 = arith.mulf %14, %8 : vector<1x128xf32>
    %c0_6 = arith.constant 0 : index
    %c0_7 = arith.constant 0 : index
    %16 = vector.load %arg3[%c0_6, %c0_7] : memref<32x128xf32, #tpu.memory_space<vmem>>, vector<32x128xf32>
    %17 = vector.broadcast %8 : vector<1x128xf32> to vector<32x128xf32>
    %18 = arith.mulf %16, %17 : vector<32x128xf32>
    %19 = arith.truncf %18 : vector<32x128xf32> to vector<32x128xbf16>
    %cst_8 = arith.constant 0.000000e+00 : f32
    %20 = vector.broadcast %cst_8 : f32 to vector<8x32xf32>
    %cst_9 = arith.constant 0.000000e+00 : f32
    %21 = vector.broadcast %cst_9 : f32 to vector<8x32xf32>
    %c0_10 = arith.constant 0 : index
    %c0_11 = arith.constant 0 : index
    %c0_12 = arith.constant 0 : index
    %22 = vector.load %arg1[%c0_10, %c0_11, %c0_12] : memref<8x8x1xf32, #tpu.memory_space<vmem>>, vector<1x8x1xf32>
    %23 = vector.shape_cast %22 : vector<1x8x1xf32> to vector<8x1xf32>
    %24 = vector.broadcast %23 : vector<8x1xf32> to vector<8x128xf32>
    %25 = vector.broadcast %13 : vector<1x128xf32> to vector<8x128xf32>
    %26 = arith.mulf %24, %25 : vector<8x128xf32>
    %27 = vector.broadcast %15 : vector<1x128xf32> to vector<8x128xf32>
    %28 = arith.addf %26, %27 : vector<8x128xf32>
    %29 = arith.truncf %20 : vector<8x32xf32> to vector<8x32xbf16>
    %cst_13 = arith.constant dense<0.000000e+00> : vector<8x128xf32>
    %30 = tpu.matmul %29, %19, %cst_13 {dimension_numbers = #tpu.dot_dimension_numbers<[1], [0], [0], [1], [0, 0, 1, 1], [], []>} : vector<8x32xbf16>, vector<32x128xbf16>, vector<8x128xf32> -> vector<8x128xf32>
    %31 = arith.addf %28, %30 : vector<8x128xf32>
    %32 = math.tanh %31 : vector<8x128xf32>
    %33 = vector.broadcast %8 : vector<1x128xf32> to vector<8x128xf32>
    %34 = arith.mulf %32, %33 : vector<8x128xf32>
    %35 = vector.broadcast %11 : vector<1x128xf32> to vector<8x128xf32>
    %36 = arith.addf %34, %35 : vector<8x128xf32>
    %37 = vector.extract_strided_slice %36 {offsets = [0, 0], sizes = [8, 32], strides = [1, 1]} : vector<8x128xf32> to vector<8x32xf32>
    %38 = vector.extract_strided_slice %36 {offsets = [0, 32], sizes = [8, 32], strides = [1, 1]} : vector<8x128xf32> to vector<8x32xf32>
    %39 = vector.extract_strided_slice %36 {offsets = [0, 64], sizes = [8, 32], strides = [1, 1]} : vector<8x128xf32> to vector<8x32xf32>
    %40 = vector.extract_strided_slice %36 {offsets = [0, 96], sizes = [8, 32], strides = [1, 1]} : vector<8x128xf32> to vector<8x32xf32>
    %41 = arith.mulf %38, %21 : vector<8x32xf32>
    %42 = arith.mulf %37, %39 : vector<8x32xf32>
    %43 = arith.addf %41, %42 : vector<8x32xf32>
    %44 = math.tanh %43 : vector<8x32xf32>
    %45 = arith.mulf %40, %44 : vector<8x32xf32>
    %c1 = arith.constant 1 : index
    %c0_14 = arith.constant 0 : index
    %c0_15 = arith.constant 0 : index
    %46 = vector.load %arg1[%c1, %c0_14, %c0_15] : memref<8x8x1xf32, #tpu.memory_space<vmem>>, vector<1x8x1xf32>
    %47 = vector.shape_cast %46 : vector<1x8x1xf32> to vector<8x1xf32>
    %48 = vector.broadcast %47 : vector<8x1xf32> to vector<8x128xf32>
    %49 = vector.broadcast %13 : vector<1x128xf32> to vector<8x128xf32>
    %50 = arith.mulf %48, %49 : vector<8x128xf32>
    %51 = vector.broadcast %15 : vector<1x128xf32> to vector<8x128xf32>
    %52 = arith.addf %50, %51 : vector<8x128xf32>
    %53 = arith.truncf %45 : vector<8x32xf32> to vector<8x32xbf16>
    %cst_16 = arith.constant dense<0.000000e+00> : vector<8x128xf32>
    %54 = tpu.matmul %53, %19, %cst_16 {dimension_numbers = #tpu.dot_dimension_numbers<[1], [0], [0], [1], [0, 0, 1, 1], [], []>} : vector<8x32xbf16>, vector<32x128xbf16>, vector<8x128xf32> -> vector<8x128xf32>
    %55 = arith.addf %52, %54 : vector<8x128xf32>
    %56 = math.tanh %55 : vector<8x128xf32>
    %57 = vector.broadcast %8 : vector<1x128xf32> to vector<8x128xf32>
    %58 = arith.mulf %56, %57 : vector<8x128xf32>
    %59 = vector.broadcast %11 : vector<1x128xf32> to vector<8x128xf32>
    %60 = arith.addf %58, %59 : vector<8x128xf32>
    %61 = vector.extract_strided_slice %60 {offsets = [0, 0], sizes = [8, 32], strides = [1, 1]} : vector<8x128xf32> to vector<8x32xf32>
    %62 = vector.extract_strided_slice %60 {offsets = [0, 32], sizes = [8, 32], strides = [1, 1]} : vector<8x128xf32> to vector<8x32xf32>
    %63 = vector.extract_strided_slice %60 {offsets = [0, 64], sizes = [8, 32], strides = [1, 1]} : vector<8x128xf32> to vector<8x32xf32>
    %64 = vector.extract_strided_slice %60 {offsets = [0, 96], sizes = [8, 32], strides = [1, 1]} : vector<8x128xf32> to vector<8x32xf32>
    %65 = arith.mulf %62, %43 : vector<8x32xf32>
    %66 = arith.mulf %61, %63 : vector<8x32xf32>
    %67 = arith.addf %65, %66 : vector<8x32xf32>
    %68 = math.tanh %67 : vector<8x32xf32>
    %69 = arith.mulf %64, %68 : vector<8x32xf32>
    %c2 = arith.constant 2 : index
    %c0_17 = arith.constant 0 : index
    %c0_18 = arith.constant 0 : index
    %70 = vector.load %arg1[%c2, %c0_17, %c0_18] : memref<8x8x1xf32, #tpu.memory_space<vmem>>, vector<1x8x1xf32>
    %71 = vector.shape_cast %70 : vector<1x8x1xf32> to vector<8x1xf32>
    %72 = vector.broadcast %71 : vector<8x1xf32> to vector<8x128xf32>
    %73 = vector.broadcast %13 : vector<1x128xf32> to vector<8x128xf32>
    %74 = arith.mulf %72, %73 : vector<8x128xf32>
    %75 = vector.broadcast %15 : vector<1x128xf32> to vector<8x128xf32>
    %76 = arith.addf %74, %75 : vector<8x128xf32>
    %77 = arith.truncf %69 : vector<8x32xf32> to vector<8x32xbf16>
    %cst_19 = arith.constant dense<0.000000e+00> : vector<8x128xf32>
    %78 = tpu.matmul %77, %19, %cst_19 {dimension_numbers = #tpu.dot_dimension_numbers<[1], [0], [0], [1], [0, 0, 1, 1], [], []>} : vector<8x32xbf16>, vector<32x128xbf16>, vector<8x128xf32> -> vector<8x128xf32>
    %79 = arith.addf %76, %78 : vector<8x128xf32>
    %80 = math.tanh %79 : vector<8x128xf32>
    %81 = vector.broadcast %8 : vector<1x128xf32> to vector<8x128xf32>
    %82 = arith.mulf %80, %81 : vector<8x128xf32>
    %83 = vector.broadcast %11 : vector<1x128xf32> to vector<8x128xf32>
    %84 = arith.addf %82, %83 : vector<8x128xf32>
    %85 = vector.extract_strided_slice %84 {offsets = [0, 0], sizes = [8, 32], strides = [1, 1]} : vector<8x128xf32> to vector<8x32xf32>
    %86 = vector.extract_strided_slice %84 {offsets = [0, 32], sizes = [8, 32], strides = [1, 1]} : vector<8x128xf32> to vector<8x32xf32>
    %87 = vector.extract_strided_slice %84 {offsets = [0, 64], sizes = [8, 32], strides = [1, 1]} : vector<8x128xf32> to vector<8x32xf32>
    %88 = vector.extract_strided_slice %84 {offsets = [0, 96], sizes = [8, 32], strides = [1, 1]} : vector<8x128xf32> to vector<8x32xf32>
    %89 = arith.mulf %86, %67 : vector<8x32xf32>
    %90 = arith.mulf %85, %87 : vector<8x32xf32>
    %91 = arith.addf %89, %90 : vector<8x32xf32>
    %92 = math.tanh %91 : vector<8x32xf32>
    %93 = arith.mulf %88, %92 : vector<8x32xf32>
    %c3 = arith.constant 3 : index
    %c0_20 = arith.constant 0 : index
    %c0_21 = arith.constant 0 : index
    %94 = vector.load %arg1[%c3, %c0_20, %c0_21] : memref<8x8x1xf32, #tpu.memory_space<vmem>>, vector<1x8x1xf32>
    %95 = vector.shape_cast %94 : vector<1x8x1xf32> to vector<8x1xf32>
    %96 = vector.broadcast %95 : vector<8x1xf32> to vector<8x128xf32>
    %97 = vector.broadcast %13 : vector<1x128xf32> to vector<8x128xf32>
    %98 = arith.mulf %96, %97 : vector<8x128xf32>
    %99 = vector.broadcast %15 : vector<1x128xf32> to vector<8x128xf32>
    %100 = arith.addf %98, %99 : vector<8x128xf32>
    %101 = arith.truncf %93 : vector<8x32xf32> to vector<8x32xbf16>
    %cst_22 = arith.constant dense<0.000000e+00> : vector<8x128xf32>
    %102 = tpu.matmul %101, %19, %cst_22 {dimension_numbers = #tpu.dot_dimension_numbers<[1], [0], [0], [1], [0, 0, 1, 1], [], []>} : vector<8x32xbf16>, vector<32x128xbf16>, vector<8x128xf32> -> vector<8x128xf32>
    %103 = arith.addf %100, %102 : vector<8x128xf32>
    %104 = math.tanh %103 : vector<8x128xf32>
    %105 = vector.broadcast %8 : vector<1x128xf32> to vector<8x128xf32>
    %106 = arith.mulf %104, %105 : vector<8x128xf32>
    %107 = vector.broadcast %11 : vector<1x128xf32> to vector<8x128xf32>
    %108 = arith.addf %106, %107 : vector<8x128xf32>
    %109 = vector.extract_strided_slice %108 {offsets = [0, 0], sizes = [8, 32], strides = [1, 1]} : vector<8x128xf32> to vector<8x32xf32>
    %110 = vector.extract_strided_slice %108 {offsets = [0, 32], sizes = [8, 32], strides = [1, 1]} : vector<8x128xf32> to vector<8x32xf32>
    %111 = vector.extract_strided_slice %108 {offsets = [0, 64], sizes = [8, 32], strides = [1, 1]} : vector<8x128xf32> to vector<8x32xf32>
    %112 = vector.extract_strided_slice %108 {offsets = [0, 96], sizes = [8, 32], strides = [1, 1]} : vector<8x128xf32> to vector<8x32xf32>
    %113 = arith.mulf %110, %91 : vector<8x32xf32>
    %114 = arith.mulf %109, %111 : vector<8x32xf32>
    %115 = arith.addf %113, %114 : vector<8x32xf32>
    %116 = math.tanh %115 : vector<8x32xf32>
    %117 = arith.mulf %112, %116 : vector<8x32xf32>
    %c4 = arith.constant 4 : index
    %c0_23 = arith.constant 0 : index
    %c0_24 = arith.constant 0 : index
    %118 = vector.load %arg1[%c4, %c0_23, %c0_24] : memref<8x8x1xf32, #tpu.memory_space<vmem>>, vector<1x8x1xf32>
    %119 = vector.shape_cast %118 : vector<1x8x1xf32> to vector<8x1xf32>
    %120 = vector.broadcast %119 : vector<8x1xf32> to vector<8x128xf32>
    %121 = vector.broadcast %13 : vector<1x128xf32> to vector<8x128xf32>
    %122 = arith.mulf %120, %121 : vector<8x128xf32>
    %123 = vector.broadcast %15 : vector<1x128xf32> to vector<8x128xf32>
    %124 = arith.addf %122, %123 : vector<8x128xf32>
    %125 = arith.truncf %117 : vector<8x32xf32> to vector<8x32xbf16>
    %cst_25 = arith.constant dense<0.000000e+00> : vector<8x128xf32>
    %126 = tpu.matmul %125, %19, %cst_25 {dimension_numbers = #tpu.dot_dimension_numbers<[1], [0], [0], [1], [0, 0, 1, 1], [], []>} : vector<8x32xbf16>, vector<32x128xbf16>, vector<8x128xf32> -> vector<8x128xf32>
    %127 = arith.addf %124, %126 : vector<8x128xf32>
    %128 = math.tanh %127 : vector<8x128xf32>
    %129 = vector.broadcast %8 : vector<1x128xf32> to vector<8x128xf32>
    %130 = arith.mulf %128, %129 : vector<8x128xf32>
    %131 = vector.broadcast %11 : vector<1x128xf32> to vector<8x128xf32>
    %132 = arith.addf %130, %131 : vector<8x128xf32>
    %133 = vector.extract_strided_slice %132 {offsets = [0, 0], sizes = [8, 32], strides = [1, 1]} : vector<8x128xf32> to vector<8x32xf32>
    %134 = vector.extract_strided_slice %132 {offsets = [0, 32], sizes = [8, 32], strides = [1, 1]} : vector<8x128xf32> to vector<8x32xf32>
    %135 = vector.extract_strided_slice %132 {offsets = [0, 64], sizes = [8, 32], strides = [1, 1]} : vector<8x128xf32> to vector<8x32xf32>
    %136 = vector.extract_strided_slice %132 {offsets = [0, 96], sizes = [8, 32], strides = [1, 1]} : vector<8x128xf32> to vector<8x32xf32>
    %137 = arith.mulf %134, %115 : vector<8x32xf32>
    %138 = arith.mulf %133, %135 : vector<8x32xf32>
    %139 = arith.addf %137, %138 : vector<8x32xf32>
    %140 = math.tanh %139 : vector<8x32xf32>
    %141 = arith.mulf %136, %140 : vector<8x32xf32>
    %c5 = arith.constant 5 : index
    %c0_26 = arith.constant 0 : index
    %c0_27 = arith.constant 0 : index
    %142 = vector.load %arg1[%c5, %c0_26, %c0_27] : memref<8x8x1xf32, #tpu.memory_space<vmem>>, vector<1x8x1xf32>
    %143 = vector.shape_cast %142 : vector<1x8x1xf32> to vector<8x1xf32>
    %144 = vector.broadcast %143 : vector<8x1xf32> to vector<8x128xf32>
    %145 = vector.broadcast %13 : vector<1x128xf32> to vector<8x128xf32>
    %146 = arith.mulf %144, %145 : vector<8x128xf32>
    %147 = vector.broadcast %15 : vector<1x128xf32> to vector<8x128xf32>
    %148 = arith.addf %146, %147 : vector<8x128xf32>
    %149 = arith.truncf %141 : vector<8x32xf32> to vector<8x32xbf16>
    %cst_28 = arith.constant dense<0.000000e+00> : vector<8x128xf32>
    %150 = tpu.matmul %149, %19, %cst_28 {dimension_numbers = #tpu.dot_dimension_numbers<[1], [0], [0], [1], [0, 0, 1, 1], [], []>} : vector<8x32xbf16>, vector<32x128xbf16>, vector<8x128xf32> -> vector<8x128xf32>
    %151 = arith.addf %148, %150 : vector<8x128xf32>
    %152 = math.tanh %151 : vector<8x128xf32>
    %153 = vector.broadcast %8 : vector<1x128xf32> to vector<8x128xf32>
    %154 = arith.mulf %152, %153 : vector<8x128xf32>
    %155 = vector.broadcast %11 : vector<1x128xf32> to vector<8x128xf32>
    %156 = arith.addf %154, %155 : vector<8x128xf32>
    %157 = vector.extract_strided_slice %156 {offsets = [0, 0], sizes = [8, 32], strides = [1, 1]} : vector<8x128xf32> to vector<8x32xf32>
    %158 = vector.extract_strided_slice %156 {offsets = [0, 32], sizes = [8, 32], strides = [1, 1]} : vector<8x128xf32> to vector<8x32xf32>
    %159 = vector.extract_strided_slice %156 {offsets = [0, 64], sizes = [8, 32], strides = [1, 1]} : vector<8x128xf32> to vector<8x32xf32>
    %160 = vector.extract_strided_slice %156 {offsets = [0, 96], sizes = [8, 32], strides = [1, 1]} : vector<8x128xf32> to vector<8x32xf32>
    %161 = arith.mulf %158, %139 : vector<8x32xf32>
    %162 = arith.mulf %157, %159 : vector<8x32xf32>
    %163 = arith.addf %161, %162 : vector<8x32xf32>
    %164 = math.tanh %163 : vector<8x32xf32>
    %165 = arith.mulf %160, %164 : vector<8x32xf32>
    %c6 = arith.constant 6 : index
    %c0_29 = arith.constant 0 : index
    %c0_30 = arith.constant 0 : index
    %166 = vector.load %arg1[%c6, %c0_29, %c0_30] : memref<8x8x1xf32, #tpu.memory_space<vmem>>, vector<1x8x1xf32>
    %167 = vector.shape_cast %166 : vector<1x8x1xf32> to vector<8x1xf32>
    %168 = vector.broadcast %167 : vector<8x1xf32> to vector<8x128xf32>
    %169 = vector.broadcast %13 : vector<1x128xf32> to vector<8x128xf32>
    %170 = arith.mulf %168, %169 : vector<8x128xf32>
    %171 = vector.broadcast %15 : vector<1x128xf32> to vector<8x128xf32>
    %172 = arith.addf %170, %171 : vector<8x128xf32>
    %173 = arith.truncf %165 : vector<8x32xf32> to vector<8x32xbf16>
    %cst_31 = arith.constant dense<0.000000e+00> : vector<8x128xf32>
    %174 = tpu.matmul %173, %19, %cst_31 {dimension_numbers = #tpu.dot_dimension_numbers<[1], [0], [0], [1], [0, 0, 1, 1], [], []>} : vector<8x32xbf16>, vector<32x128xbf16>, vector<8x128xf32> -> vector<8x128xf32>
    %175 = arith.addf %172, %174 : vector<8x128xf32>
    %176 = math.tanh %175 : vector<8x128xf32>
    %177 = vector.broadcast %8 : vector<1x128xf32> to vector<8x128xf32>
    %178 = arith.mulf %176, %177 : vector<8x128xf32>
    %179 = vector.broadcast %11 : vector<1x128xf32> to vector<8x128xf32>
    %180 = arith.addf %178, %179 : vector<8x128xf32>
    %181 = vector.extract_strided_slice %180 {offsets = [0, 0], sizes = [8, 32], strides = [1, 1]} : vector<8x128xf32> to vector<8x32xf32>
    %182 = vector.extract_strided_slice %180 {offsets = [0, 32], sizes = [8, 32], strides = [1, 1]} : vector<8x128xf32> to vector<8x32xf32>
    %183 = vector.extract_strided_slice %180 {offsets = [0, 64], sizes = [8, 32], strides = [1, 1]} : vector<8x128xf32> to vector<8x32xf32>
    %184 = vector.extract_strided_slice %180 {offsets = [0, 96], sizes = [8, 32], strides = [1, 1]} : vector<8x128xf32> to vector<8x32xf32>
    %185 = arith.mulf %182, %163 : vector<8x32xf32>
    %186 = arith.mulf %181, %183 : vector<8x32xf32>
    %187 = arith.addf %185, %186 : vector<8x32xf32>
    %188 = math.tanh %187 : vector<8x32xf32>
    %189 = arith.mulf %184, %188 : vector<8x32xf32>
    %c7 = arith.constant 7 : index
    %c0_32 = arith.constant 0 : index
    %c0_33 = arith.constant 0 : index
    %190 = vector.load %arg1[%c7, %c0_32, %c0_33] : memref<8x8x1xf32, #tpu.memory_space<vmem>>, vector<1x8x1xf32>
    %191 = vector.shape_cast %190 : vector<1x8x1xf32> to vector<8x1xf32>
    %192 = vector.broadcast %191 : vector<8x1xf32> to vector<8x128xf32>
    %193 = vector.broadcast %13 : vector<1x128xf32> to vector<8x128xf32>
    %194 = arith.mulf %192, %193 : vector<8x128xf32>
    %195 = vector.broadcast %15 : vector<1x128xf32> to vector<8x128xf32>
    %196 = arith.addf %194, %195 : vector<8x128xf32>
    %197 = arith.truncf %189 : vector<8x32xf32> to vector<8x32xbf16>
    %cst_34 = arith.constant dense<0.000000e+00> : vector<8x128xf32>
    %198 = tpu.matmul %197, %19, %cst_34 {dimension_numbers = #tpu.dot_dimension_numbers<[1], [0], [0], [1], [0, 0, 1, 1], [], []>} : vector<8x32xbf16>, vector<32x128xbf16>, vector<8x128xf32> -> vector<8x128xf32>
    %199 = arith.addf %196, %198 : vector<8x128xf32>
    %200 = math.tanh %199 : vector<8x128xf32>
    %201 = vector.broadcast %8 : vector<1x128xf32> to vector<8x128xf32>
    %202 = arith.mulf %200, %201 : vector<8x128xf32>
    %203 = vector.broadcast %11 : vector<1x128xf32> to vector<8x128xf32>
    %204 = arith.addf %202, %203 : vector<8x128xf32>
    %205 = vector.extract_strided_slice %204 {offsets = [0, 0], sizes = [8, 32], strides = [1, 1]} : vector<8x128xf32> to vector<8x32xf32>
    %206 = vector.extract_strided_slice %204 {offsets = [0, 32], sizes = [8, 32], strides = [1, 1]} : vector<8x128xf32> to vector<8x32xf32>
    %207 = vector.extract_strided_slice %204 {offsets = [0, 64], sizes = [8, 32], strides = [1, 1]} : vector<8x128xf32> to vector<8x32xf32>
    %208 = vector.extract_strided_slice %204 {offsets = [0, 96], sizes = [8, 32], strides = [1, 1]} : vector<8x128xf32> to vector<8x32xf32>
    %209 = arith.mulf %206, %187 : vector<8x32xf32>
    %210 = arith.mulf %205, %207 : vector<8x32xf32>
    %211 = arith.addf %209, %210 : vector<8x32xf32>
    %212 = math.tanh %211 : vector<8x32xf32>
    %213 = arith.mulf %208, %212 : vector<8x32xf32>
    %c0_35 = arith.constant 0 : index
    %c0_36 = arith.constant 0 : index
    %214 = vector.load %arg5[%c0_35, %c0_36] : memref<32x10xf32, #tpu.memory_space<vmem>>, vector<32x10xf32>
    %215 = arith.truncf %214 : vector<32x10xf32> to vector<32x10xbf16>
    %c0_37 = arith.constant 0 : index
    %c0_38 = arith.constant 0 : index
    %216 = vector.load %arg7[%c0_37, %c0_38] : memref<10x18xf32, #tpu.memory_space<vmem>>, vector<10x18xf32>
    %217 = arith.truncf %216 : vector<10x18xf32> to vector<10x18xbf16>
    %218 = arith.truncf %213 : vector<8x32xf32> to vector<8x32xbf16>
    %cst_39 = arith.constant dense<0.000000e+00> : vector<8x10xf32>
    %219 = tpu.matmul %218, %215, %cst_39 {dimension_numbers = #tpu.dot_dimension_numbers<[1], [0], [0], [1], [0, 0, 1, 1], [], []>} : vector<8x32xbf16>, vector<32x10xbf16>, vector<8x10xf32> -> vector<8x10xf32>
    %c0_40 = arith.constant 0 : index
    %c0_41 = arith.constant 0 : index
    %220 = vector.load %arg6[%c0_40, %c0_41] : memref<1x10xf32, #tpu.memory_space<vmem>>, vector<1x10xf32>
    %221 = vector.broadcast %220 : vector<1x10xf32> to vector<8x10xf32>
    %222 = arith.addf %219, %221 : vector<8x10xf32>
    %cst_42 = arith.constant 0.000000e+00 : f32
    %223 = vector.broadcast %cst_42 : f32 to vector<8x10xf32>
    %224 = arith.maximumf %222, %223 : vector<8x10xf32>
    %225 = arith.truncf %224 : vector<8x10xf32> to vector<8x10xbf16>
    %cst_43 = arith.constant dense<0.000000e+00> : vector<8x18xf32>
    %226 = tpu.matmul %225, %217, %cst_43 {dimension_numbers = #tpu.dot_dimension_numbers<[1], [0], [0], [1], [0, 0, 1, 1], [], []>} : vector<8x10xbf16>, vector<10x18xbf16>, vector<8x18xf32> -> vector<8x18xf32>
    %c0_44 = arith.constant 0 : index
    %c0_45 = arith.constant 0 : index
    %227 = vector.load %arg8[%c0_44, %c0_45] : memref<1x18xf32, #tpu.memory_space<vmem>>, vector<1x18xf32>
    %228 = vector.broadcast %227 : vector<1x18xf32> to vector<8x18xf32>
    %229 = arith.addf %226, %228 : vector<8x18xf32>
    %cst_46 = arith.constant dense<0xFF800000> : vector<8xf32>
    %230 = vector.multi_reduction <maximumf>, %229, %cst_46 [1] : vector<8x18xf32> to vector<8xf32>
    %231 = vector.shape_cast %230 : vector<8xf32> to vector<8x1xf32>
    %232 = vector.broadcast %231 : vector<8x1xf32> to vector<8x18xf32>
    %233 = arith.subf %229, %232 : vector<8x18xf32>
    %234 = math.exp %233 : vector<8x18xf32>
    %cst_47 = arith.constant dense<0.000000e+00> : vector<8xf32>
    %235 = vector.multi_reduction <add>, %234, %cst_47 [1] : vector<8x18xf32> to vector<8xf32>
    %236 = vector.shape_cast %235 : vector<8xf32> to vector<8x1xf32>
    %237 = vector.broadcast %236 : vector<8x1xf32> to vector<8x18xf32>
    %238 = arith.divf %234, %237 : vector<8x18xf32>
    %c0_48 = arith.constant 0 : index
    %c0_49 = arith.constant 0 : index
    %239 = vector.load %arg9[%c0_48, %c0_49] : memref<8x18xf32, #tpu.memory_space<vmem>>, vector<8x18xf32>
    tpu.vector_store %arg9[%c0_48, %c0_49], %238 {strides = array<i32>} : memref<8x18xf32, #tpu.memory_space<vmem>>, vector<8x18xf32>,
    return
  }
  func.func @transform_0(%arg0: i32) -> (i32, i32, i32) {
    %c0_i32 = arith.constant 0 : i32
    %c0_i32_0 = arith.constant 0 : i32
    %c0_i32_1 = arith.constant 0 : i32
    return %c0_i32, %arg0, %c0_i32_0 : i32, i32, i32
  }
  func.func @transform_1(%arg0: i32) -> (i32, i32) {
    %c0_i32 = arith.constant 0 : i32
    %c0_i32_0 = arith.constant 0 : i32
    %c0_i32_1 = arith.constant 0 : i32
    return %c0_i32, %c0_i32_0 : i32, i32
  }
  func.func @transform_2(%arg0: i32) -> (i32, i32) {
    %c0_i32 = arith.constant 0 : i32
    %c0_i32_0 = arith.constant 0 : i32
    %c0_i32_1 = arith.constant 0 : i32
    return %c0_i32, %c0_i32_0 : i32, i32
  }
  func.func @transform_3(%arg0: i32) -> (i32, i32) {
    %c0_i32 = arith.constant 0 : i32
    %c0_i32_0 = arith.constant 0 : i32
    %c0_i32_1 = arith.constant 0 : i32
    return %c0_i32, %c0_i32_0 : i32, i32
  }
  func.func @transform_4(%arg0: i32) -> (i32, i32) {
    %c0_i32 = arith.constant 0 : i32
    %c0_i32_0 = arith.constant 0 : i32
    %c0_i32_1 = arith.constant 0 : i32
    return %c0_i32, %c0_i32_0 : i32, i32
  }
  func.func @transform_5(%arg0: i32) -> (i32, i32) {
    %c0_i32 = arith.constant 0 : i32
    %c0_i32_0 = arith.constant 0 : i32
    %c0_i32_1 = arith.constant 0 : i32
    return %c0_i32, %c0_i32_0 : i32, i32
  }
  func.func @transform_6(%arg0: i32) -> (i32, i32) {
    %c0_i32 = arith.constant 0 : i32
    %c0_i32_0 = arith.constant 0 : i32
    %c0_i32_1 = arith.constant 0 : i32
    return %c0_i32, %c0_i32_0 : i32, i32
  }
  func.func @transform_7(%arg0: i32) -> (i32, i32) {
    %c0_i32 = arith.constant 0 : i32
    %c0_i32_0 = arith.constant 0 : i32
    %c0_i32_1 = arith.constant 0 : i32
    return %c0_i32, %c0_i32_0 : i32, i32
  }
  func.func @transform_8(%arg0: i32) -> (i32, i32) {
    %c0_i32 = arith.constant 0 : i32
    %c0_i32_0 = arith.constant 0 : i32
    return %arg0, %c0_i32 : i32, i32
  }
}

</mosaic_0001>

<bundles_post_ra>
// kernel: tpu_custom_call.1
= control target key start
LH: loop header
LB: loop body
LE: loop exit
PB: predicated region body
PF: predicated region fallthrough
CT: control target
= control target key end

     0   :  { %v31_v0 = vlaneseq  ;;  %v1015_v1 = vmov 0.0   ;;  %vm1016_vm0 = vmmov 0   ;;  %v1017_v4 = vmov 0   ;;  %s1292_s0 = inlined_call_operand.vmem [shape: f32[8,8,1], index: 0, kind: input, shape index: {}]   ;;  %s1293_s1 = inlined_call_operand.vmem [shape: f32[1,128], index: 1, kind: input, shape index: {}]   ;;  %s1294_s2 = inlined_call_operand.vmem [shape: f32[32,128], index: 2, kind: input, shape index: {}]   ;;  %s1295_s3 = inlined_call_operand.vmem [shape: f32[1,128], index: 3, kind: input, shape index: {}]   ;;  %s1296_s4 = inlined_call_operand.vmem [shape: f32[32,10], index: 4, kind: input, shape index: {}]   ;;  %s1297_s5 = inlined_call_operand.vmem [shape: f32[1,10], index: 5, kind: input, shape index: {}]   ;;  %s1298_s6 = inlined_call_operand.vmem [shape: f32[10,18], index: 6, kind: input, shape index: {}]   ;;  %s1299_s7 = inlined_call_operand.vmem [shape: f32[1,18], index: 7, kind: input, shape index: {}]   ;;  %s1300_s8 = inlined_call_operand.hbm [shape: f32[8,18], index: 8, kind: output, shape index: {}]  }
   0x1   :  { %870 = vmatprep.subr.bf16.mxu0 %v1015_v1  ;;  %874 = vmatprep.mubr.msk.bf16.mxu0 %vm1016_vm0, %v1015_v1  ;;  %v52_v2 = vld [vmem:[%s1292_s0] sm:$0xff] }
   0x2   :  { %v32_v3 = vand.u32 127, %v31_v0  ;;  %955 = vset.pattern.permute.xlu0 %v1017_v4  ;;  %878 = vmatprep.subr.bf16.mxu1 %v1015_v1 }
   0x3   :  { %13 = vsyncpa [#allocation3], 0  ;;  %v44_v5 = vld [vmem:[%s1294_s2 + $0x10] sm:$0xff]  ;;  %55 = vperm.xlu0 %955, %v52_v2   ;;  %882 = vmatprep.mubr.msk.bf16.mxu1 %vm1016_vm0, %v1015_v1  ;;  %v45_v6 = vld [vmem:[%s1294_s2 + $0x18] sm:$0xff]  ;;  %v1018_v10 = vmov 0.5   ;;  %v60_v18 = vshrl.u32 %v31_v0, 7 }
   0x4   :  { %vm33_vm1 = vcmp.ge.s32.totalorder %v32_v3, 64  ;;  %vm34_vm2 = vcmp.lt.s32.totalorder %v32_v3, 96  ;;  %v42_v7 = vld [vmem:[%s1294_s2] sm:$0xff]  ;;  %v43_v8 = vld [vmem:[%s1294_s2 + $0x8] sm:$0xff]  ;;  %956 = vset.pattern.permute.xlu1 %v1017_v4  ;;  %vm72_vm4 = vcmask 261120   ;;  %v825_v3 = vld [vmem:[%s1292_s0 + $0x10] sm:$0xff] }
   0x5   :  { %vm1088_vm3 = vmand %vm33_vm1, %vm34_vm2  ;;  %v38_v19 = vld [vmem:[%s1293_s1] sm:$0x1]  ;;  %v61_v21 = vsub.s32 0, %v60_v18  ;;  %s1019_s1 = smov 64   ;;  %v823_v44 = vld [vmem:[%s1292_s0 + $0x8] sm:$0xff]  ;;  %vm752_vm5 = vcmask 1044480  }
   0x6   :  { %v1094_v11 = vsel %vm1088_vm3, 1.0, %v1018_v10  ;;  %v40_v22 = vld [vmem:[%s1295_s3] sm:$0x1]  ;;  %v1134_v35 = vsel %vm1088_vm3, 0.0, %v1018_v10  ;;  %s1020_s3 = smov 32   ;;  %vm748_vm6 = vcmask 80896  }
   0x7   :  { %v48_v12 = vmul.f32 %v44_v5, %v1094_v11  ;;  %v49_v13 = vmul.f32 %v45_v6, %v1094_v11  ;;  %v46_v14 = vmul.f32 %v42_v7, %v1094_v11  ;;  %v47_v15 = vmul.f32 %v43_v8, %v1094_v11 }
   0x8   :  { %v39_v20 = vmul.f32 %v38_v19, %v1094_v11  ;;  %v41_v24 = vmul.f32 %v40_v22, %v1094_v11  ;;  %vm796_vm7 = vcmask 146432  }
   0x9   :  { %v1100_v16 = vpack.c.bf16 %v49_v13, %v48_v12  ;;  %v1103_v17 = vpack.c.bf16 %v47_v15, %v46_v14 }
   0xa   :  { %v1125_v23 = vrot.slane %v39_v20, %v61_v21  ;;  %v1129_v27 = vrot.slane %v41_v24, %v61_v21 }
   0xb   :  { %871 = vmatpush3.bf16.msra.mxu0 %v1100_v16  ;;  %879 = vmatpush3.bf16.msra.mxu1 %v1100_v16 }
   0xc   :  { %872 = vmatprep.subr.bf16.mxu0 %v1015_v1  ;;  %880 = vmatprep.subr.bf16.mxu1 %v1015_v1 }
   0xf   :  { %873 = vmatpush3.bf16.msra.mxu0 %v1103_v17  ;;  %881 = vmatpush3.bf16.msra.mxu1 %v1103_v17 }
  0x10   :  { %886 = vmatprep.subr.bf16.mxu0 %v1015_v1  ;;  %894 = vmatprep.subr.bf16.mxu1 %v1015_v1 }
  0x12   :  { %875 = vmatmul.mubr.bf16.vlgmr.msra.gmra.mxu0 %v1017_v4 }
  0x13   :  { %887 = vmatpush3.bf16.msra.mxu0 %v1100_v16  ;;  %890 = vmatprep.mubr.msk.bf16.mxu0 %vm1016_vm0, %v1015_v1 }
  0x14   :  { %888 = vmatprep.subr.bf16.mxu0 %v1015_v1 }
  0x17   :  { %889 = vmatpush3.bf16.msra.mxu0 %v1103_v17 }
  0x18   :  { %902 = vmatprep.subr.bf16.mxu0 %v1015_v1 }
  0x7e   :  { %v56_v25 = vpop.permute.xlu0 %55 }
  0x7f   :  { %v64_v26 = vmul.f32 %v1125_v23, %v56_v25 }
  0x81   :  { %v71_v28 = vadd.f32 %v1129_v27, %v64_v26 }
  0xd2   :  { %v110_v29 = vpop.f32.mrf.mxu0 }
  0xd3   :  { %v116_v30 = vadd.f32 %v110_v29, %v71_v28 }
  0xd4   :  { %v876_v31 = vpop.f32.mrf.mxu0 }
  0xd5   :  { %957 = vtanh.f32 %v116_v30  ;;  %v827_v30 = vld [vmem:[%s1292_s0 + $0x18] sm:$0xff] }
  0xd6   :  { %v113_v32 = vpop.f32.mrf.mxu0 }
  0xd8   :  { %v877_v33 = vpop.f32.mrf.mxu0 }
  0xe2   :  { %v958_v34 = vpop.eup %957 }
  0xe3   :  { %v118_v36 = vmul.f32 %v958_v34, %v1094_v11 }
  0xe5   :  { %v119_v37 = vadd.f32 %v118_v36, %v1134_v35 }
  0xe7   :  { %122 = vrot.lane.b32.xlu0 %v119_v37, %s1019_s1  ;;  %v120_v40 = vmul.f32 0.0, %v119_v37 }
 0x159   :  { %v123_v38 = vpop.permute.xlu0 %122 }
 0x15a   :  { %v125_v39 = vmul.f32 %v123_v38, %v119_v37 }
 0x15c   :  { %127 = vrot.lane.b32.xlu1 %v125_v39, %s1020_s3 }
 0x1ce   :  { %v128_v41 = vpop.permute.xlu1 %127 }
 0x1cf   :  { %v130_v42 = vadd.f32 %v128_v41, %v120_v40 }
 0x1d1   :  { %959 = vtanh.f32 %v130_v42 }
 0x1de   :  { %v960_v43 = vpop.eup %959 }
 0x1df   :  { %133 = vrot.lane.b32.xlu1 %v960_v43, %s1019_s1 }
 0x1e3   :  { %141 = vperm.xlu1 %956, %v823_v44  }
 0x251   :  { %v134_v45 = vpop.permute.xlu1 %133 }
 0x252   :  { %v136_v46 = vmul.f32 %v134_v45, %v119_v37 }
 0x254   :  { %v146_v47 = vpack.c.bf16 %v136_v46, %v136_v46 }
 0x256   :  { %148 = vrot.lane.b32.xlu0 %v146_v47, %s1020_s3 }
 0x25e   :  { %v142_v49 = vpop.permute.xlu1 %141 }
 0x25f   :  { %v144_v50 = vmul.f32 %v142_v49, %v1125_v23 }
 0x261   :  { %v145_v51 = vadd.f32 %v144_v50, %v1129_v27 }
 0x2c8   :  { %v149_v48 = vpop.permute.xlu0 %148 }
 0x2c9   :  { %883 = vmatmul.mubr.msk.bf16.vlgmr.msra.gmra.mxu1 %vm72_vm4, %v149_v48 }
 0x2ca   :  { %895 = vmatpush3.bf16.msra.mxu1 %v1100_v16  ;;  %898 = vmatprep.mubr.msk.bf16.mxu1 %vm1016_vm0, %v1015_v1 }
 0x2cb   :  { %896 = vmatprep.subr.bf16.mxu1 %v1015_v1 }
 0x2ce   :  { %897 = vmatpush3.bf16.msra.mxu1 %v1103_v17 }
 0x2cf   :  { %910 = vmatprep.subr.bf16.mxu1 %v1015_v1 }
 0x389   :  { %v187_v52 = vpop.f32.mrf.mxu1 }
 0x38a   :  { %v193_v53 = vadd.f32 %v187_v52, %v145_v51 }
 0x38b   :  { %v884_v54 = vpop.f32.mrf.mxu1 }
 0x38c   :  { %961 = vtanh.f32 %v193_v53  ;;  %v829_v53 = vld [vmem:[%s1292_s0 + $0x20] sm:$0xff] }
 0x38d   :  { %v190_v55 = vpop.f32.mrf.mxu1 }
 0x38f   :  { %v885_v56 = vpop.f32.mrf.mxu1 }
 0x399   :  { %v962_v57 = vpop.eup %961 }
 0x39a   :  { %v195_v58 = vmul.f32 %v962_v57, %v1094_v11 }
 0x39c   :  { %v196_v59 = vadd.f32 %v195_v58, %v1134_v35 }
 0x39e   :  { %199 = vrot.lane.b32.xlu0 %v196_v59, %s1019_s1  ;;  %v197_v62 = vmul.f32 %v196_v59, %v130_v42 }
 0x410   :  { %v200_v60 = vpop.permute.xlu0 %199 }
 0x411   :  { %v202_v61 = vmul.f32 %v200_v60, %v196_v59 }
 0x413   :  { %204 = vrot.lane.b32.xlu1 %v202_v61, %s1020_s3 }
 0x485   :  { %v205_v63 = vpop.permute.xlu1 %204 }
 0x486   :  { %v207_v0 = vadd.f32 %v205_v63, %v197_v62 }
 0x488   :  { %963 = vtanh.f32 %v207_v0 }
 0x495   :  { %v964_v2 = vpop.eup %963 }
 0x496   :  { %210 = vrot.lane.b32.xlu0 %v964_v2, %s1019_s1 }
 0x49a   :  { %218 = vperm.xlu0 %955, %v825_v3  }
 0x508   :  { %v211_v4 = vpop.permute.xlu0 %210 }
 0x509   :  { %v213_v5 = vmul.f32 %v211_v4, %v196_v59 }
 0x50b   :  { %v223_v6 = vpack.c.bf16 %v213_v5, %v213_v5 }
 0x50d   :  { %225 = vrot.lane.b32.xlu1 %v223_v6, %s1020_s3 }
 0x515   :  { %v219_v8 = vpop.permute.xlu0 %218 }
 0x516   :  { %v221_v9 = vmul.f32 %v219_v8, %v1125_v23 }
 0x518   :  { %v222_v10 = vadd.f32 %v221_v9, %v1129_v27 }
 0x57f   :  { %v226_v7 = vpop.permute.xlu1 %225 }
 0x580   :  { %891 = vmatmul.mubr.msk.bf16.vlgmr.msra.gmra.mxu0 %vm72_vm4, %v226_v7 }
 0x581   :  { %903 = vmatpush3.bf16.msra.mxu0 %v1100_v16  ;;  %906 = vmatprep.mubr.msk.bf16.mxu0 %vm1016_vm0, %v1015_v1 }
 0x582   :  { %904 = vmatprep.subr.bf16.mxu0 %v1015_v1 }
 0x585   :  { %905 = vmatpush3.bf16.msra.mxu0 %v1103_v17 }
 0x586   :  { %918 = vmatprep.subr.bf16.mxu0 %v1015_v1 }
 0x640   :  { %v264_v12 = vpop.f32.mrf.mxu0 }
 0x641   :  { %v270_v13 = vadd.f32 %v264_v12, %v222_v10 }
 0x642   :  { %v892_v14 = vpop.f32.mrf.mxu0 }
 0x643   :  { %965 = vtanh.f32 %v270_v13  ;;  %v831_v13 = vld [vmem:[%s1292_s0 + $0x28] sm:$0xff] }
 0x644   :  { %v267_v15 = vpop.f32.mrf.mxu0 }
 0x646   :  { %v893_v18 = vpop.f32.mrf.mxu0 }
 0x650   :  { %v966_v19 = vpop.eup %965 }
 0x651   :  { %v272_v20 = vmul.f32 %v966_v19, %v1094_v11 }
 0x653   :  { %v273_v21 = vadd.f32 %v272_v20, %v1134_v35 }
 0x655   :  { %276 = vrot.lane.b32.xlu1 %v273_v21, %s1019_s1  ;;  %v274_v25 = vmul.f32 %v273_v21, %v207_v0 }
 0x6c7   :  { %v277_v22 = vpop.permute.xlu1 %276 }
 0x6c8   :  { %v279_v24 = vmul.f32 %v277_v22, %v273_v21 }
 0x6ca   :  { %281 = vrot.lane.b32.xlu0 %v279_v24, %s1020_s3 }
 0x73c   :  { %v282_v26 = vpop.permute.xlu0 %281 }
 0x73d   :  { %v284_v28 = vadd.f32 %v282_v26, %v274_v25 }
 0x73f   :  { %967 = vtanh.f32 %v284_v28 }
 0x74c   :  { %v968_v29 = vpop.eup %967 }
 0x74d   :  { %287 = vrot.lane.b32.xlu1 %v968_v29, %s1019_s1 }
 0x751   :  { %295 = vperm.xlu1 %956, %v827_v30  }
 0x7bf   :  { %v288_v31 = vpop.permute.xlu1 %287 }
 0x7c0   :  { %v290_v32 = vmul.f32 %v288_v31, %v273_v21 }
 0x7c2   :  { %v300_v33 = vpack.c.bf16 %v290_v32, %v290_v32 }
 0x7c4   :  { %302 = vrot.lane.b32.xlu0 %v300_v33, %s1020_s3 }
 0x7cc   :  { %v296_v36 = vpop.permute.xlu1 %295 }
 0x7cd   :  { %v298_v37 = vmul.f32 %v296_v36, %v1125_v23 }
 0x7cf   :  { %v299_v38 = vadd.f32 %v298_v37, %v1129_v27 }
 0x836   :  { %v303_v34 = vpop.permute.xlu0 %302 }
 0x837   :  { %899 = vmatmul.mubr.msk.bf16.vlgmr.msra.gmra.mxu1 %vm72_vm4, %v303_v34 }
 0x838   :  { %911 = vmatpush3.bf16.msra.mxu1 %v1100_v16  ;;  %914 = vmatprep.mubr.msk.bf16.mxu1 %vm1016_vm0, %v1015_v1 }
 0x839   :  { %912 = vmatprep.subr.bf16.mxu1 %v1015_v1 }
 0x83c   :  { %913 = vmatpush3.bf16.msra.mxu1 %v1103_v17 }
 0x83d   :  { %926 = vmatprep.subr.bf16.mxu1 %v1015_v1 }
 0x8f7   :  { %v341_v39 = vpop.f32.mrf.mxu1 }
 0x8f8   :  { %v347_v40 = vadd.f32 %v341_v39, %v299_v38  ;;  %v833_v38 = vld [vmem:[%s1292_s0 + $0x30] sm:$0xff] }
 0x8f9   :  { %v900_v41 = vpop.f32.mrf.mxu1 }
 0x8fa   :  { %969 = vtanh.f32 %v347_v40 }
 0x8fb   :  { %v344_v42 = vpop.f32.mrf.mxu1 }
 0x8fd   :  { %v901_v43 = vpop.f32.mrf.mxu1 }
 0x907   :  { %v970_v44 = vpop.eup %969 }
 0x908   :  { %v349_v45 = vmul.f32 %v970_v44, %v1094_v11 }
 0x90a   :  { %v350_v46 = vadd.f32 %v349_v45, %v1134_v35 }
 0x90c   :  { %353 = vrot.lane.b32.xlu0 %v350_v46, %s1019_s1  ;;  %v351_v49 = vmul.f32 %v350_v46, %v284_v28 }
 0x97e   :  { %v354_v47 = vpop.permute.xlu0 %353 }
 0x97f   :  { %v356_v48 = vmul.f32 %v354_v47, %v350_v46 }
 0x981   :  { %358 = vrot.lane.b32.xlu1 %v356_v48, %s1020_s3 }
 0x9f3   :  { %v359_v50 = vpop.permute.xlu1 %358 }
 0x9f4   :  { %v361_v51 = vadd.f32 %v359_v50, %v351_v49 }
 0x9f6   :  { %971 = vtanh.f32 %v361_v51 }
 0xa03   :  { %v972_v52 = vpop.eup %971 }
 0xa04   :  { %364 = vrot.lane.b32.xlu0 %v972_v52, %s1019_s1 }
 0xa08   :  { %372 = vperm.xlu0 %955, %v829_v53  }
 0xa76   :  { %v365_v54 = vpop.permute.xlu0 %364 }
 0xa77   :  { %v367_v55 = vmul.f32 %v365_v54, %v350_v46 }
 0xa79   :  { %v377_v56 = vpack.c.bf16 %v367_v55, %v367_v55 }
 0xa7b   :  { %379 = vrot.lane.b32.xlu1 %v377_v56, %s1020_s3 }
 0xa83   :  { %v373_v58 = vpop.permute.xlu0 %372 }
 0xa84   :  { %v375_v59 = vmul.f32 %v373_v58, %v1125_v23 }
 0xa86   :  { %v376_v60 = vadd.f32 %v375_v59, %v1129_v27 }
 0xaed   :  { %v380_v57 = vpop.permute.xlu1 %379 }
 0xaee   :  { %907 = vmatmul.mubr.msk.bf16.vlgmr.msra.gmra.mxu0 %vm72_vm4, %v380_v57 }
 0xaef   :  { %919 = vmatpush3.bf16.msra.mxu0 %v1100_v16  ;;  %922 = vmatprep.mubr.msk.bf16.mxu0 %vm1016_vm0, %v1015_v1 }
 0xaf0   :  { %920 = vmatprep.subr.bf16.mxu0 %v1015_v1 }
 0xaf3   :  { %921 = vmatpush3.bf16.msra.mxu0 %v1103_v17 }
 0xaf4   :  { %934 = vmatprep.subr.bf16.mxu0 %v1015_v1 }
 0xbae   :  { %v418_v61 = vpop.f32.mrf.mxu0 }
 0xbaf   :  { %v424_v62 = vadd.f32 %v418_v61, %v376_v60  ;;  %v835_v60 = vld [vmem:[%s1292_s0 + $0x38] sm:$0xff] }
 0xbb0   :  { %v908_v63 = vpop.f32.mrf.mxu0 }
 0xbb1   :  { %973 = vtanh.f32 %v424_v62 }
 0xbb2   :  { %v421_v0 = vpop.f32.mrf.mxu0 }
 0xbb4   :  { %v909_v2 = vpop.f32.mrf.mxu0 }
 0xbbe   :  { %v974_v3 = vpop.eup %973 }
 0xbbf   :  { %v426_v4 = vmul.f32 %v974_v3, %v1094_v11 }
 0xbc1   :  { %v427_v5 = vadd.f32 %v426_v4, %v1134_v35 }
 0xbc3   :  { %430 = vrot.lane.b32.xlu1 %v427_v5, %s1019_s1  ;;  %v428_v8 = vmul.f32 %v427_v5, %v361_v51 }
 0xc35   :  { %v431_v6 = vpop.permute.xlu1 %430 }
 0xc36   :  { %v433_v7 = vmul.f32 %v431_v6, %v427_v5 }
 0xc38   :  { %435 = vrot.lane.b32.xlu0 %v433_v7, %s1020_s3 }
 0xcaa   :  { %v436_v9 = vpop.permute.xlu0 %435 }
 0xcab   :  { %v438_v10 = vadd.f32 %v436_v9, %v428_v8 }
 0xcad   :  { %975 = vtanh.f32 %v438_v10 }
 0xcba   :  { %v976_v12 = vpop.eup %975 }
 0xcbb   :  { %441 = vrot.lane.b32.xlu1 %v976_v12, %s1019_s1 }
 0xcbf   :  { %449 = vperm.xlu1 %956, %v831_v13  }
 0xd2d   :  { %v442_v14 = vpop.permute.xlu1 %441 }
 0xd2e   :  { %v444_v15 = vmul.f32 %v442_v14, %v427_v5 }
 0xd30   :  { %v454_v18 = vpack.c.bf16 %v444_v15, %v444_v15 }
 0xd32   :  { %456 = vrot.lane.b32.xlu0 %v454_v18, %s1020_s3 }
 0xd3a   :  { %v450_v20 = vpop.permute.xlu1 %449 }
 0xd3b   :  { %v452_v21 = vmul.f32 %v450_v20, %v1125_v23 }
 0xd3d   :  { %v453_v22 = vadd.f32 %v452_v21, %v1129_v27  ;;  %v677_v21 = vld [vmem:[%s1296_s4 + $0x8] sm:$0xff] }
 0xda4   :  { %v457_v19 = vpop.permute.xlu0 %456 }
 0xda5   :  { %915 = vmatmul.mubr.msk.bf16.vlgmr.msra.gmra.mxu1 %vm72_vm4, %v457_v19  ;;  %v678_v19 = vld [vmem:[%s1296_s4 + $0x10] sm:$0xff] }
 0xda6   :  { %927 = vmatpush3.bf16.msra.mxu1 %v1100_v16  ;;  %930 = vmatprep.mubr.msk.bf16.mxu1 %vm1016_vm0, %v1015_v1 }
 0xda7   :  { %928 = vmatprep.subr.bf16.mxu1 %v1015_v1 }
 0xdaa   :  { %929 = vmatpush3.bf16.msra.mxu1 %v1103_v17 }
 0xdab   :  { %942 = vmatprep.subr.bf16.mxu1 %v1015_v1 }
 0xe65   :  { %v495_v24 = vpop.f32.mrf.mxu1 }
 0xe66   :  { %v501_v25 = vadd.f32 %v495_v24, %v453_v22 }
 0xe67   :  { %v916_v26 = vpop.f32.mrf.mxu1 }
 0xe68   :  { %977 = vtanh.f32 %v501_v25  ;;  %v682_v25 = vld [vmem:[%s1298_s6] sm:$0xff]  ;;  %v683_v26 = vld [vmem:[%s1298_s6 + $0x8] sm:$0x3] }
 0xe69   :  { %v498_v28 = vpop.f32.mrf.mxu1 }
 0xe6a   :  { %v684_v28 = vpack.c.bf16 %v683_v26, %v682_v25 }
 0xe6b   :  { %v917_v16 = vpop.f32.mrf.mxu1 }
 0xe6c   :  { %v754_v16 = vsel %vm752_vm5, %v684_v28, 0 }
 0xe75   :  { %v978_v29 = vpop.eup %977 }
 0xe76   :  { %v503_v30 = vmul.f32 %v978_v29, %v1094_v11 }
 0xe78   :  { %v504_v31 = vadd.f32 %v503_v30, %v1134_v35 }
 0xe7a   :  { %507 = vrot.lane.b32.xlu0 %v504_v31, %s1019_s1  ;;  %v505_v33 = vmul.f32 %v504_v31, %v438_v10 }
 0xeec   :  { %v508_v17 = vpop.permute.xlu0 %507 }
 0xeed   :  { %v510_v32 = vmul.f32 %v508_v17, %v504_v31  ;;  %v837_v17 = vld [vmem:[%s1297_s5] ss:$0 sm:$0xff]  ;;  %s1021_s5 = smov [#allocation2]  }
 0xeef   :  { %512 = vrot.lane.b32.xlu1 %v510_v32, %s1020_s3 }
 0xf61   :  { %v513_v34 = vpop.permute.xlu1 %512 }
 0xf62   :  { %v515_v36 = vadd.f32 %v513_v34, %v505_v33 }
 0xf64   :  { %979 = vtanh.f32 %v515_v36 }
 0xf71   :  { %v980_v37 = vpop.eup %979 }
 0xf72   :  { %518 = vrot.lane.b32.xlu0 %v980_v37, %s1019_s1 }
 0xf76   :  { %526 = vperm.xlu0 %955, %v833_v38  }
 0xfe4   :  { %v519_v39 = vpop.permute.xlu0 %518 }
 0xfe5   :  { %v521_v40 = vmul.f32 %v519_v39, %v504_v31 }
 0xfe7   :  { %v531_v41 = vpack.c.bf16 %v521_v40, %v521_v40  ;;  %v839_v40 = vld [vmem:[%s1299_s7] ss:$0 sm:$0xff]  ;;  %s815_s7 = sshll.u32 %s1021_s5, 4  ;;  %s816_s7 = int_to_ptr.vmem [resolvable:$true] %s815_s7 }
 0xfe8   :  { %p998_p1 = scmp.lt.s32.totalorder %s816_s7, %s816_s7 }
 0xfe9   :  { %533 = vrot.lane.b32.xlu1 %v531_v41, %s1020_s3 }
 0xff1   :  { %v527_v43 = vpop.permute.xlu0 %526 }
 0xff2   :  { %v529_v44 = vmul.f32 %v527_v43, %v1125_v23 }
 0xff4   :  { %v530_v45 = vadd.f32 %v529_v44, %v1129_v27 }
0x105b   :  { %v534_v42 = vpop.permute.xlu1 %533 }
0x105c   :  { %923 = vmatmul.mubr.msk.bf16.vlgmr.msra.gmra.mxu0 %vm72_vm4, %v534_v42 }
0x105d   :  { %938 = vmatprep.mubr.msk.bf16.mxu0 %vm1016_vm0, %v1015_v1 }
0x111c   :  { %v572_v46 = vpop.f32.mrf.mxu0 }
0x111d   :  { %v578_v47 = vadd.f32 %v572_v46, %v530_v45 }
0x111e   :  { %v924_v48 = vpop.f32.mrf.mxu0 }
0x111f   :  { %981 = vtanh.f32 %v578_v47 }
0x1120   :  { %v575_v49 = vpop.f32.mrf.mxu0 }
0x1122   :  { %v925_v50 = vpop.f32.mrf.mxu0 }
0x112c   :  { %v982_v51 = vpop.eup %981 }
0x112d   :  { %v580_v52 = vmul.f32 %v982_v51, %v1094_v11 }
0x112f   :  { %v581_v53 = vadd.f32 %v580_v52, %v1134_v35 }
0x1131   :  { %584 = vrot.lane.b32.xlu1 %v581_v53, %s1019_s1  ;;  %v582_v56 = vmul.f32 %v581_v53, %v515_v36 }
0x11a3   :  { %v585_v54 = vpop.permute.xlu1 %584 }
0x11a4   :  { %v587_v55 = vmul.f32 %v585_v54, %v581_v53 }
0x11a6   :  { %589 = vrot.lane.b32.xlu0 %v587_v55, %s1020_s3 }
0x1218   :  { %v590_v57 = vpop.permute.xlu0 %589 }
0x1219   :  { %v592_v58 = vadd.f32 %v590_v57, %v582_v56 }
0x121b   :  { %983 = vtanh.f32 %v592_v58 }
0x1228   :  { %v984_v59 = vpop.eup %983 }
0x1229   :  { %595 = vrot.lane.b32.xlu1 %v984_v59, %s1019_s1 }
0x122d   :  { %603 = vperm.xlu1 %956, %v835_v60  }
0x129b   :  { %v596_v61 = vpop.permute.xlu1 %595 }
0x129c   :  { %v598_v62 = vmul.f32 %v596_v61, %v581_v53 }
0x129e   :  { %v608_v63 = vpack.c.bf16 %v598_v62, %v598_v62 }
0x12a0   :  { %610 = vrot.lane.b32.xlu0 %v608_v63, %s1020_s3 }
0x12a8   :  { %v604_v2 = vpop.permute.xlu1 %603 }
0x12a9   :  { %v606_v3 = vmul.f32 %v604_v2, %v1125_v23 }
0x12ab   :  { %v607_v4 = vadd.f32 %v606_v3, %v1129_v27 }
0x1312   :  { %v611_v0 = vpop.permute.xlu0 %610 }
0x1313   :  { %931 = vmatmul.mubr.msk.bf16.vlgmr.msra.gmra.mxu1 %vm72_vm4, %v611_v0 }
0x1314   :  { %944 = vmatprep.mubr.msk.bf16.mxu1 %vm1016_vm0, %v1015_v1  ;;  %943 = vmatpush3.bf16.msra.mxu1 %v754_v16 }
0x13d3   :  { %v649_v5 = vpop.f32.mrf.mxu1 }
0x13d4   :  { %v655_v6 = vadd.f32 %v649_v5, %v607_v4 }
0x13d5   :  { %v932_v7 = vpop.f32.mrf.mxu1 }
0x13d6   :  { %985 = vtanh.f32 %v655_v6 }
0x13d7   :  { %v652_v8 = vpop.f32.mrf.mxu1 }
0x13d9   :  { %v933_v9 = vpop.f32.mrf.mxu1 }
0x13e3   :  { %v986_v10 = vpop.eup %985 }
0x13e4   :  { %v657_v12 = vmul.f32 %v986_v10, %v1094_v11  ;;  %v679_v11 = vld [vmem:[%s1296_s4 + $0x18] sm:$0xff] }
0x13e5   :  { %v681_v20 = vpack.c.bf16 %v679_v11, %v678_v19 }
0x13e6   :  { %v658_v13 = vadd.f32 %v657_v12, %v1134_v35  ;;  %v676_v35 = vld [vmem:[%s1296_s4] sm:$0xff] }
0x13e7   :  { %935 = vmatpush3.bf16.msra.mxu0 %v681_v20  ;;  %v680_v22 = vpack.c.bf16 %v677_v21, %v676_v35 }
0x13e8   :  { %661 = vrot.lane.b32.xlu0 %v658_v13, %s1019_s1  ;;  %v659_v23 = vmul.f32 %v658_v13, %v592_v58  ;;  %936 = vmatprep.subr.bf16.mxu0 %v1015_v1 }
0x13eb   :  { %937 = vmatpush3.bf16.msra.mxu0 %v680_v22 }
0x145a   :  { %v662_v14 = vpop.permute.xlu0 %661 }
0x145b   :  { %v664_v15 = vmul.f32 %v662_v14, %v658_v13 }
0x145d   :  { %666 = vrot.lane.b32.xlu1 %v664_v15, %s1020_s3 }
0x14cf   :  { %v667_v18 = vpop.permute.xlu1 %666 }
0x14d0   :  { %v669_v27 = vadd.f32 %v667_v18, %v659_v23 }
0x14d2   :  { %987 = vtanh.f32 %v669_v27 }
0x14df   :  { %v988_v24 = vpop.eup %987 }
0x14e0   :  { %672 = vrot.lane.b32.xlu0 %v988_v24, %s1019_s1 }
0x1552   :  { %v673_v29 = vpop.permute.xlu0 %672 }
0x1553   :  { %v675_v30 = vmul.f32 %v673_v29, %v658_v13 }
0x1555   :  { %v685_v31 = vpack.c.bf16 %v675_v30, %v675_v30 }
0x1557   :  { %694 = vrot.lane.b32.xlu1 %v685_v31, %s1020_s3  ;;  %s993_s3 = scalar_lea.vmem %s816_s7, 128 }
0x1558   :  { %p994_p0 = scmp.ne.s32.totalorder %s816_s7, %s993_s3  ;;  %p999_p2 = scmp.lt.s32.totalorder %s993_s3, %s993_s3 }
0x155a   :  { %p1000_p3 = por %p999_p2, %p998_p1 }
0x155c   :  { %p1001_p4 = pnand %p1000_p3, %p994_p0 }
0x15c9   :  { %v695_v1 = vpop.permute.xlu1 %694 }
0x15ca   :  { %939 = vmatmul.mubr.msk.bf16.vlgmr.msra.gmra.mxu0 %vm72_vm4, %v695_v1 }
0x168a   :  { %v733_v32 = vpop.f32.mrf.mxu0 }
0x168b   :  { %v734_v33 = vadd.f32 %v837_v17, %v733_v32 }
0x168c   :  { %v940_v34 = vpop.f32.mrf.mxu0 }
0x168d   :  { %v739_v36 = vmax.f32 %v734_v33, 0.0 }
0x168e   :  { %v736_v37 = vpop.f32.mrf.mxu0 }
0x168f   :  { %v740_v38 = vpack.c.bf16 %v739_v36, %v739_v36 }
0x1690   :  { %v941_v39 = vpop.f32.mrf.mxu0 }
0x1691   :  { %945 = vmatmul.mubr.msk.bf16.vlgmr.msra.gmra.mxu1 %vm748_vm6, %v740_v38 }
0x1751   :  { %v790_v41 = vpop.f32.mrf.mxu1 }
0x1752   :  { %v791_v42 = vadd.f32 %v839_v40, %v790_v41 }
0x1753   :  { %v946_v43 = vpop.f32.mrf.mxu1 }
0x1754   :  { %v797_v44 = vsel %vm796_vm7, %v791_v42, -inf }
0x1755   :  { %798 = vmax.xlane.f32.xlu0 %v797_v44  ;;  %v793_v45 = vpop.f32.mrf.mxu1 }
0x1757   :  { %v947_v46 = vpop.f32.mrf.mxu1 }
0x17de   :  { %v799_v47 = vpop.xlane.xlu0 %798 }
0x17df   :  { %v800_v48 = vsub.f32 %v791_v42, %v799_v47 }
0x17e1   :  { %v801_v49 = vmul.f32 1.442695, %v800_v48 }
0x17e3   :  { %989 = vpow2.f32 %v801_v49 }
0x17f0   :  { %v990_v50 = vpop.eup %989 }
0x17f1   :  { %v803_v51 = vsel %vm796_vm7, %v990_v50, 0.0 }
0x17f2   :  { %804 = vadd.xlane.f32.xlu1 %v803_v51 }
0x187b   :  { %v805_v52 = vpop.xlane.xlu1 %804 }
0x187c   :  { %991 = vrcp.f32 %v805_v52 }
0x1889   :  { %v992_v53 = vpop.eup %991 }
0x188a   :  { %v807_v54 = vmul.f32 %v992_v53, %v990_v50 }
0x188c   :  { %808 = vst.msk [vmem:[#allocation2] sm:$0xff] %vm796_vm7, %v807_v54 }
0x188d   :  { %1004 = shalt.err (!%p1001_p4)
}
0x188e   :  { %818 = dma.vmem_to_hbm [thread:$0]  %s816_s7, 128, %s1300_s8, [#allocation3]  }
0x188f   :  { %1013 = dma.done.wait [#allocation3], 128  }
0x1890   :  { %1014 = vsyncadd [#allocation3], 4294967168 }
0x1891   :  { %822 = vsyncpa [#allocation3], 1 }

</bundles_post_ra>
